<compile_context>
chip_gen: v6e
topology: v6e:2x2x1
jax: 0.10.0
libtpu: 0.0.40
codegen_flags: <defaults>
</compile_context>

<pallas_src>
import functools

import jax
import jax.numpy as jnp
from jax.experimental import pallas as pl
from jax.experimental.pallas import tpu as pltpu


# ---------------------------------------------------------------------------
# Kernel
# ---------------------------------------------------------------------------
def _attn_pool_kernel(x_ref, mask_ref, w1t_ref, b1_ref, w2_ref, b2_ref,
                      out_ref, den_ref, *, mask_lane_major):
    # x_ref:    (bt, ts, H) bf16   -- one S-chunk of the batch tile
    # mask_ref: (bt, 1, ts) f32 if mask_lane_major else (bt, ts, 1) f32
    # w1t_ref:  (H, H) bf16        -- pre-transposed fc1 weight (in x out)
    # b1_ref:   (1, H) f32
    # w2_ref:   (1, H) f32         -- fc2 weight row
    # b2_ref:   (1,)  f32 (SMEM scalar)
    # out_ref:  (bt, 1, H) f32     -- resident numerator accumulator / output
    # den_ref:  (bt, 1, 1) f32     -- resident denominator accumulator (scratch)
    bt, ts, h = x_ref.shape
    j = pl.program_id(1)

    @pl.when(j == 0)
    def _init():
        out_ref[...] = jnp.zeros_like(out_ref)
        den_ref[...] = jnp.zeros_like(den_ref)

    xc = x_ref[...]                                            # (bt, ts, h) bf16

    # fc1 + tanh: bf16 MXU matmul, f32 accumulation.
    e = jnp.tanh(
        jnp.dot(xc.reshape(bt * ts, h), w1t_ref[...],
                preferred_element_type=jnp.float32)
        + b1_ref[...]
    )                                                          # (bt*ts, h) f32

    # fc2 score: VPU broadcast-multiply + lane reduce (no N=1 MXU matmul).
    logits = jnp.sum(e.reshape(bt, ts, h) * w2_ref[...].reshape(1, 1, h),
                     axis=-1, keepdims=True)                   # (bt, ts, 1) f32

    if mask_lane_major:
        # Mask arrives lane-dense (bt, 1, ts); one tiny lane->sublane relayout.
        m = mask_ref[...].reshape(bt, ts, 1)
    else:
        m = mask_ref[...]                                      # (bt, ts, 1)

    # Unnormalized attention weights for this chunk (matches torch: exp, then
    # mask multiply, no max-subtraction).
    a = jnp.exp(logits + b2_ref[0]) * m                        # (bt, ts, 1) f32

    # Online accumulation of denominator and weighted sum (chunk-local f32
    # cast of x -- no full-tile f32 copy ever exists).
    den_ref[...] += jnp.sum(a, axis=1, keepdims=True)                      # (bt,1,1)
    out_ref[...] += jnp.sum(a * xc.astype(jnp.float32), axis=1, keepdims=True)  # (bt,1,h)

    @pl.when(j == pl.num_programs(1) - 1)
    def _finalize():
        out_ref[...] = out_ref[...] * pl.reciprocal(den_ref[...] + 1e-8,
                                                    approx=True)


# ---------------------------------------------------------------------------
# Tiling derivation (VMEM-budgeted, generation-agnostic: fits v7x's 64 MiB)
# ---------------------------------------------------------------------------
_VMEM_BUDGET_BYTES = 24 << 20  # per-step working-set budget (headroom below v7x)


def _r8(v):
    return -(-v // 8) * 8


def _r128(v):
    return -(-v // 128) * 128


def _step_vmem_bytes(bt, ts, h):
    """Generous per-grid-step VMEM estimate from actual block shapes."""
    x_blk = bt * _r8(ts) * _r128(h) * 2           # bf16 x chunk
    e_f32 = _r8(bt * ts) * _r128(h) * 4           # fc1/tanh intermediate
    xc_f32 = bt * _r8(ts) * _r128(h) * 4          # chunk-local f32 cast for pooling
    w1 = _r8(h) * _r128(h) * 2                    # W1^T (single-buffered)
    mask = bt * 8 * _r128(ts) * 4                 # (bt,1,ts) block, sublane-padded
    out_acc = bt * 8 * _r128(h) * 4               # resident (bt,1,H) accumulator
    small = 4 * 8 * _r128(h) * 4 + 8 * 128 * 4    # b1, w2, den scratch, misc
    # x and mask double-buffered; +1 x-sized slab of compiler temporaries.
    return 2 * x_blk + 2 * mask + e_f32 + xc_f32 + x_blk + w1 + out_acc + small


def _derive_tiling(b, s, h, budget=_VMEM_BUDGET_BYTES):
    """Pick (bt, ts): bt divides B (prefer >=2 batch steps for v7x megacore),
    ts divides S and is lane-aligned (ts == S or ts % 128 == 0)."""
    bt_cands = sorted((d for d in range(1, b + 1) if b % d == 0),
                      key=lambda d: (0 if b // d >= 2 else 1, -d))
    ts_cands = sorted((d for d in range(1, s + 1)
                       if s % d == 0 and (d == s or d % 128 == 0)),
                      reverse=True)
    for bt in bt_cands:
        for ts in ts_cands:
            if _step_vmem_bytes(bt, ts, h) <= budget:
                return bt, ts
    return 1, ts_cands[-1]


# ---------------------------------------------------------------------------
# Wrapper
# ---------------------------------------------------------------------------
def attention_pooling(x, w1, b1, w2, b2, attn_mask=None):
    """x: (B, S, H), attn_mask: (B, S) or None. Returns (B, H) float32."""
    B, S, H = x.shape
    if attn_mask is None:
        attn_mask = jnp.ones((B, S), dtype=jnp.float32)
    attn_mask = attn_mask.astype(jnp.float32)

    bt, ts = _derive_tiling(B, S, H)
    est = _step_vmem_bytes(bt, ts, H)
    vmem_limit = int(min(max(2 * est, 16 << 20), 48 << 20))

    x_bf = x.astype(jnp.bfloat16)                     # streamed per-chunk in bf16
    w1t = jnp.transpose(w1).astype(jnp.bfloat16)      # (in, out), resident
    b1_2d = b1.reshape(1, H).astype(jnp.float32)
    w2_row = w2.reshape(1, H).astype(jnp.float32)
    b2_1d = b2.reshape(1).astype(jnp.float32)         # SMEM scalar

    grid = (B // bt, S // ts)

    def build(mask_lane_major, single_buffer_consts):
        if single_buffer_consts:
            const_kw = {"pipeline_mode": pl.Buffered(1)}
        else:
            const_kw = {}
        const_specs = [
            pl.BlockSpec((H, H), lambda i, j: (0, 0), **const_kw),   # W1^T
            pl.BlockSpec((1, H), lambda i, j: (0, 0), **const_kw),   # b1
            pl.BlockSpec((1, H), lambda i, j: (0, 0), **const_kw),   # w2 row
        ]
        if mask_lane_major:
            mask_arr = attn_mask.reshape(B, 1, S)
            mask_spec = pl.BlockSpec((bt, 1, ts), lambda i, j: (i, 0, j))
        else:
            mask_arr = attn_mask.reshape(B, S, 1)
            mask_spec = pl.BlockSpec((bt, ts, 1), lambda i, j: (i, j, 0))

        kernel = functools.partial(_attn_pool_kernel,
                                   mask_lane_major=mask_lane_major)
        call = pl.pallas_call(
            kernel,
            out_shape=jax.ShapeDtypeStruct((B, 1, H), jnp.float32),
            grid_spec=pltpu.PrefetchScalarGridSpec(
                num_scalar_prefetch=0,
                grid=grid,
                in_specs=[
                    pl.BlockSpec((bt, ts, H), lambda i, j: (i, j, 0)),   # x chunk
                    mask_spec,                                           # mask
                    *const_specs,                                        # W1^T, b1, w2
                    pl.BlockSpec(memory_space=pltpu.MemorySpace.SMEM),   # b2 scalar
                ],
                out_specs=pl.BlockSpec((bt, 1, H), lambda i, j: (i, 0, 0)),
                scratch_shapes=[pltpu.VMEM((bt, 1, 1), jnp.float32)],    # denom
            ),
            compiler_params=pltpu.CompilerParams(
                dimension_semantics=("parallel", "arbitrary"),
                vmem_limit_bytes=vmem_limit,
            ),
        )
        return call(x_bf, mask_arr, w1t, b1_2d, w2_row, b2_1d)

    try:
        # Optimized path: lane-dense (B,1,S) mask + single-buffered constants.
        out = jax.block_until_ready(build(True, True))
    except Exception:
        # Conservative fallback (known-good lowering): (B,S,1) mask layout and
        # default double buffering; identical math.
        out = jax.block_until_ready(build(False, False))

    return out.reshape(B, H)


# ---------------------------------------------------------------------------
# Pure-JAX f32 reference mirroring the PyTorch forward.
# ---------------------------------------------------------------------------
def _reference(x, w1, b1, w2, b2, attn_mask=None):
    e = jnp.tanh(jnp.einsum("bsh,oh->bso", x, w1) + b1)
    alpha = jnp.exp(jnp.einsum("bsh,oh->bso", e, w2) + b2)      # (B, S, 1)
    if attn_mask is not None:
        alpha = alpha * attn_mask[:, :, None]
    alpha = alpha / (jnp.sum(alpha, axis=1, keepdims=True) + 1e-8)
    out = jnp.einsum("bhs,bso->bho", jnp.transpose(x, (0, 2, 1)), alpha)
    return out.reshape(x.shape[0], -1)


if __name__ == "__main__":
    # config: hidden_size=32, initializer_range=0.02
    B, S, H = 2, 8, 32
    initializer_range = 0.02

    key = jax.random.PRNGKey(0)
    kx, kw1, kw2, km = jax.random.split(key, 4)

    x = jax.random.normal(kx, (B, S, H), dtype=jnp.float32)
    # nn.Linear(hidden, hidden): weight (H, H) ~ N(0, init_range), bias zeros
    w1 = initializer_range * jax.random.normal(kw1, (H, H), dtype=jnp.float32)
    b1 = jnp.zeros((H,), dtype=jnp.float32)
    # nn.Linear(hidden, 1): weight (1, H) ~ N(0, init_range), bias zeros
    w2 = initializer_range * jax.random.normal(kw2, (1, H), dtype=jnp.float32)
    b2 = jnp.zeros((1,), dtype=jnp.float32)
    # binary attention mask (B, S)
    attn_mask = (jax.random.uniform(km, (B, S)) > 0.2).astype(jnp.float32)

    out = attention_pooling(x, w1, b1, w2, b2, attn_mask)
    out = jax.block_until_ready(out)

    ref = _reference(x, w1, b1, w2, b2, attn_mask)
    assert out.shape == (B, H)
    # bf16 fc1/pooling feed + approx reciprocal -> bf16-scale tolerance.
    assert jnp.allclose(out, ref, atol=2e-2, rtol=2e-2), "mismatch vs reference"

    print("KERNEL_OK")
</pallas_src>

<mosaic_0001>
module attributes {stable_mosaic.version = 11 : i64} {
  func.func @_attn_pool_kernel(%arg0: i32, %arg1: i32, %arg2: memref<1x8x32xbf16, #tpu.memory_space<vmem>>, %arg3: memref<1x1x8xf32, #tpu.memory_space<vmem>>, %arg4: memref<32x32xbf16, #tpu.memory_space<vmem>>, %arg5: memref<1x32xf32, #tpu.memory_space<vmem>>, %arg6: memref<1x32xf32, #tpu.memory_space<vmem>>, %arg7: memref<1xf32, #tpu.memory_space<smem>>, %arg8: memref<1x1x32xf32, #tpu.memory_space<vmem>>, %arg9: memref<1x1x1xf32, #tpu.memory_space<vmem>>) attributes {dimension_semantics = [#tpu.dimension_semantics<parallel>, #tpu.dimension_semantics<arbitrary>], iteration_bounds = array<i64: 2, 1>, scalar_prefetch = 0 : i64, scratch_operands = 1 : i64, tpu.core_type = #tpu.core_type<tc>, window_params = [{transform_indices = @transform_0, window_bounds = array<i64: 1, 8, 32>}, {transform_indices = @transform_1, window_bounds = array<i64: 1, 1, 8>}, {pipeline_mode = #tpu.pipeline_mode<synchronous>, transform_indices = @transform_2, window_bounds = array<i64: 32, 32>}, {pipeline_mode = #tpu.pipeline_mode<synchronous>, transform_indices = @transform_3, window_bounds = array<i64: 1, 32>}, {pipeline_mode = #tpu.pipeline_mode<synchronous>, transform_indices = @transform_4, window_bounds = array<i64: 1, 32>}, {transform_indices = @transform_5, window_bounds = array<i64: 1>}, {transform_indices = @transform_6, window_bounds = array<i64: 1, 1, 32>}]} {
    %c0_i32 = arith.constant 0 : i32
    %0 = arith.cmpi eq, %arg1, %c0_i32 : i32
    %1 = arith.extui %0 : i1 to i32
    %c0_i32_0 = arith.constant 0 : i32
    %2 = arith.cmpi ne, %1, %c0_i32_0 : i32
    scf.if %2 {
      %cst_30 = arith.constant 0.000000e+00 : f32
      %41 = vector.broadcast %cst_30 : f32 to vector<1x1x32xf32>
      %c0_31 = arith.constant 0 : index
      %c0_32 = arith.constant 0 : index
      %c0_33 = arith.constant 0 : index
      %42 = vector.load %arg8[%c0_31, %c0_32, %c0_33] : memref<1x1x32xf32, #tpu.memory_space<vmem>>, vector<1x1x32xf32>
      tpu.vector_store %arg8[%c0_31, %c0_32, %c0_33], %41 {strides = array<i32>} : memref<1x1x32xf32, #tpu.memory_space<vmem>>, vector<1x1x32xf32>,
      %cst_34 = arith.constant 0.000000e+00 : f32
      %43 = vector.broadcast %cst_34 : f32 to vector<1x1x1xf32>
      %c0_35 = arith.constant 0 : index
      %c0_36 = arith.constant 0 : index
      %c0_37 = arith.constant 0 : index
      %44 = vector.load %arg9[%c0_35, %c0_36, %c0_37] : memref<1x1x1xf32, #tpu.memory_space<vmem>>, vector<1x1x1xf32>
      tpu.vector_store %arg9[%c0_35, %c0_36, %c0_37], %43 {strides = array<i32>} : memref<1x1x1xf32, #tpu.memory_space<vmem>>, vector<1x1x1xf32>,
    } else {
    }
    %c0 = arith.constant 0 : index
    %c0_1 = arith.constant 0 : index
    %c0_2 = arith.constant 0 : index
    %3 = vector.load %arg2[%c0, %c0_1, %c0_2] : memref<1x8x32xbf16, #tpu.memory_space<vmem>>, vector<1x8x32xbf16>
    %4 = vector.shape_cast %3 : vector<1x8x32xbf16> to vector<8x32xbf16>
    %c0_3 = arith.constant 0 : index
    %c0_4 = arith.constant 0 : index
    %5 = vector.load %arg4[%c0_3, %c0_4] : memref<32x32xbf16, #tpu.memory_space<vmem>>, vector<32x32xbf16>
    %cst = arith.constant dense<0.000000e+00> : vector<8x32xf32>
    %6 = tpu.matmul %4, %5, %cst {dimension_numbers = #tpu.dot_dimension_numbers<[1], [0], [0], [1], [0, 0, 1, 1], [], []>} : vector<8x32xbf16>, vector<32x32xbf16>, vector<8x32xf32> -> vector<8x32xf32>
    %c0_5 = arith.constant 0 : index
    %c0_6 = arith.constant 0 : index
    %7 = vector.load %arg5[%c0_5, %c0_6] : memref<1x32xf32, #tpu.memory_space<vmem>>, vector<1x32xf32>
    %8 = vector.broadcast %7 : vector<1x32xf32> to vector<8x32xf32>
    %9 = arith.addf %6, %8 : vector<8x32xf32>
    %10 = math.tanh %9 : vector<8x32xf32>
    %11 = vector.shape_cast %10 : vector<8x32xf32> to vector<1x8x32xf32>
    %c0_7 = arith.constant 0 : index
    %c0_8 = arith.constant 0 : index
    %12 = vector.load %arg6[%c0_7, %c0_8] : memref<1x32xf32, #tpu.memory_space<vmem>>, vector<1x32xf32>
    %13 = vector.shape_cast %12 : vector<1x32xf32> to vector<1x1x32xf32>
    %14 = vector.broadcast %13 : vector<1x1x32xf32> to vector<1x8x32xf32>
    %15 = arith.mulf %11, %14 : vector<1x8x32xf32>
    %cst_9 = arith.constant dense<0.000000e+00> : vector<1x8xf32>
    %16 = vector.multi_reduction <add>, %15, %cst_9 [2] : vector<1x8x32xf32> to vector<1x8xf32>
    %17 = vector.shape_cast %16 : vector<1x8xf32> to vector<1x8x1xf32>
    %c0_10 = arith.constant 0 : index
    %c0_11 = arith.constant 0 : index
    %c0_12 = arith.constant 0 : index
    %18 = vector.load %arg3[%c0_10, %c0_11, %c0_12] : memref<1x1x8xf32, #tpu.memory_space<vmem>>, vector<1x1x8xf32>
    %19 = vector.shape_cast %18 : vector<1x1x8xf32> to vector<1x8x1xf32>
    %c0_13 = arith.constant 0 : index
    %20 = memref.load %arg7[%c0_13] : memref<1xf32, #tpu.memory_space<smem>>
    %21 = vector.broadcast %20 : f32 to vector<1x8x1xf32>
    %22 = arith.addf %17, %21 : vector<1x8x1xf32>
    %23 = math.exp %22 : vector<1x8x1xf32>
    %24 = arith.mulf %23, %19 : vector<1x8x1xf32>
    %c0_14 = arith.constant 0 : index
    %c0_15 = arith.constant 0 : index
    %c0_16 = arith.constant 0 : index
    %25 = vector.load %arg9[%c0_14, %c0_15, %c0_16] : memref<1x1x1xf32, #tpu.memory_space<vmem>>, vector<1x1x1xf32>
    %cst_17 = arith.constant dense<0.000000e+00> : vector<1x1xf32>
    %26 = vector.multi_reduction <add>, %24, %cst_17 [1] : vector<1x8x1xf32> to vector<1x1xf32>
    %27 = vector.shape_cast %26 : vector<1x1xf32> to vector<1x1x1xf32>
    %28 = arith.addf %25, %27 : vector<1x1x1xf32>
    %c0_18 = arith.constant 0 : index
    %c0_19 = arith.constant 0 : index
    %c0_20 = arith.constant 0 : index
    %29 = vector.load %arg9[%c0_18, %c0_19, %c0_20] : memref<1x1x1xf32, #tpu.memory_space<vmem>>, vector<1x1x1xf32>
    tpu.vector_store %arg9[%c0_18, %c0_19, %c0_20], %28 {strides = array<i32>} : memref<1x1x1xf32, #tpu.memory_space<vmem>>, vector<1x1x1xf32>,
    %c0_21 = arith.constant 0 : index
    %c0_22 = arith.constant 0 : index
    %c0_23 = arith.constant 0 : index
    %30 = vector.load %arg8[%c0_21, %c0_22, %c0_23] : memref<1x1x32xf32, #tpu.memory_space<vmem>>, vector<1x1x32xf32>
    %31 = arith.extf %3 : vector<1x8x32xbf16> to vector<1x8x32xf32>
    %32 = vector.broadcast %24 : vector<1x8x1xf32> to vector<1x8x32xf32>
    %33 = arith.mulf %32, %31 : vector<1x8x32xf32>
    %cst_24 = arith.constant dense<0.000000e+00> : vector<1x32xf32>
    %34 = vector.multi_reduction <add>, %33, %cst_24 [1] : vector<1x8x32xf32> to vector<1x32xf32>
    %35 = vector.shape_cast %34 : vector<1x32xf32> to vector<1x1x32xf32>
    %36 = arith.addf %30, %35 : vector<1x1x32xf32>
    %c0_25 = arith.constant 0 : index
    %c0_26 = arith.constant 0 : index
    %c0_27 = arith.constant 0 : index
    %37 = vector.load %arg8[%c0_25, %c0_26, %c0_27] : memref<1x1x32xf32, #tpu.memory_space<vmem>>, vector<1x1x32xf32>
    tpu.vector_store %arg8[%c0_25, %c0_26, %c0_27], %36 {strides = array<i32>} : memref<1x1x32xf32, #tpu.memory_space<vmem>>, vector<1x1x32xf32>,
    %c0_i32_28 = arith.constant 0 : i32
    %38 = arith.cmpi eq, %arg1, %c0_i32_28 : i32
    %39 = arith.extui %38 : i1 to i32
    %c0_i32_29 = arith.constant 0 : i32
    %40 = arith.cmpi ne, %39, %c0_i32_29 : i32
    scf.if %40 {
      %c0_30 = arith.constant 0 : index
      %c0_31 = arith.constant 0 : index
      %c0_32 = arith.constant 0 : index
      %41 = vector.load %arg8[%c0_30, %c0_31, %c0_32] : memref<1x1x32xf32, #tpu.memory_space<vmem>>, vector<1x1x32xf32>
      %c0_33 = arith.constant 0 : index
      %c0_34 = arith.constant 0 : index
      %c0_35 = arith.constant 0 : index
      %42 = vector.load %arg9[%c0_33, %c0_34, %c0_35] : memref<1x1x1xf32, #tpu.memory_space<vmem>>, vector<1x1x1xf32>
      %cst_36 = arith.constant 9.99999993E-9 : f32
      %43 = vector.broadcast %cst_36 : f32 to vector<1x1x1xf32>
      %44 = arith.addf %42, %43 : vector<1x1x1xf32>
      %45 = tpu.reciprocal %44 {approx = true} : vector<1x1x1xf32> -> vector<1x1x1xf32>
      %46 = vector.broadcast %45 : vector<1x1x1xf32> to vector<1x1x32xf32>
      %47 = arith.mulf %41, %46 : vector<1x1x32xf32>
      %c0_37 = arith.constant 0 : index
      %c0_38 = arith.constant 0 : index
      %c0_39 = arith.constant 0 : index
      %48 = vector.load %arg8[%c0_37, %c0_38, %c0_39] : memref<1x1x32xf32, #tpu.memory_space<vmem>>, vector<1x1x32xf32>
      tpu.vector_store %arg8[%c0_37, %c0_38, %c0_39], %47 {strides = array<i32>} : memref<1x1x32xf32, #tpu.memory_space<vmem>>, vector<1x1x32xf32>,
    } else {
    }
    return
  }
  func.func @transform_0(%arg0: i32, %arg1: i32) -> (i32, i32, i32) {
    %c0_i32 = arith.constant 0 : i32
    %c0_i32_0 = arith.constant 0 : i32
    return %arg0, %arg1, %c0_i32 : i32, i32, i32
  }
  func.func @transform_1(%arg0: i32, %arg1: i32) -> (i32, i32, i32) {
    %c0_i32 = arith.constant 0 : i32
    %c0_i32_0 = arith.constant 0 : i32
    return %arg0, %c0_i32, %arg1 : i32, i32, i32
  }
  func.func @transform_2(%arg0: i32, %arg1: i32) -> (i32, i32) {
    %c0_i32 = arith.constant 0 : i32
    %c0_i32_0 = arith.constant 0 : i32
    %c0_i32_1 = arith.constant 0 : i32
    return %c0_i32, %c0_i32_0 : i32, i32
  }
  func.func @transform_3(%arg0: i32, %arg1: i32) -> (i32, i32) {
    %c0_i32 = arith.constant 0 : i32
    %c0_i32_0 = arith.constant 0 : i32
    %c0_i32_1 = arith.constant 0 : i32
    return %c0_i32, %c0_i32_0 : i32, i32
  }
  func.func @transform_4(%arg0: i32, %arg1: i32) -> (i32, i32) {
    %c0_i32 = arith.constant 0 : i32
    %c0_i32_0 = arith.constant 0 : i32
    %c0_i32_1 = arith.constant 0 : i32
    return %c0_i32, %c0_i32_0 : i32, i32
  }
  func.func @transform_5(%arg0: i32, %arg1: i32) -> i32 {
    %c0_i32 = arith.constant 0 : i32
    %c0_i32_0 = arith.constant 0 : i32
    return %c0_i32 : i32
  }
  func.func @transform_6(%arg0: i32, %arg1: i32) -> (i32, i32, i32) {
    %c0_i32 = arith.constant 0 : i32
    %c0_i32_0 = arith.constant 0 : i32
    %c0_i32_1 = arith.constant 0 : i32
    return %arg0, %c0_i32, %c0_i32_0 : i32, i32, i32
  }
}

module attributes {stable_mosaic.version = 11 : i64} {
  func.func @_attn_pool_kernel(%arg0: i32, %arg1: i32, %arg2: memref<1x8x32xbf16, #tpu.memory_space<vmem>>, %arg3: memref<1x8x1xf32, #tpu.memory_space<vmem>>, %arg4: memref<32x32xbf16, #tpu.memory_space<vmem>>, %arg5: memref<1x32xf32, #tpu.memory_space<vmem>>, %arg6: memref<1x32xf32, #tpu.memory_space<vmem>>, %arg7: memref<1xf32, #tpu.memory_space<smem>>, %arg8: memref<1x1x32xf32, #tpu.memory_space<vmem>>, %arg9: memref<1x1x1xf32, #tpu.memory_space<vmem>>) attributes {dimension_semantics = [#tpu.dimension_semantics<parallel>, #tpu.dimension_semantics<arbitrary>], iteration_bounds = array<i64: 2, 1>, scalar_prefetch = 0 : i64, scratch_operands = 1 : i64, tpu.core_type = #tpu.core_type<tc>, window_params = [{transform_indices = @transform_0, window_bounds = array<i64: 1, 8, 32>}, {transform_indices = @transform_1, window_bounds = array<i64: 1, 8, 1>}, {pipeline_mode = #tpu.pipeline_mode<synchronous>, transform_indices = @transform_2, window_bounds = array<i64: 32, 32>}, {pipeline_mode = #tpu.pipeline_mode<synchronous>, transform_indices = @transform_3, window_bounds = array<i64: 1, 32>}, {pipeline_mode = #tpu.pipeline_mode<synchronous>, transform_indices = @transform_4, window_bounds = array<i64: 1, 32>}, {transform_indices = @transform_5, window_bounds = array<i64: 1>}, {transform_indices = @transform_6, window_bounds = array<i64: 1, 1, 32>}]} {
    %c0_i32 = arith.constant 0 : i32
    %0 = arith.cmpi eq, %arg1, %c0_i32 : i32
    %1 = arith.extui %0 : i1 to i32
    %c0_i32_0 = arith.constant 0 : i32
    %2 = arith.cmpi ne, %1, %c0_i32_0 : i32
    scf.if %2 {
      %cst_30 = arith.constant 0.000000e+00 : f32
      %40 = vector.broadcast %cst_30 : f32 to vector<1x1x32xf32>
      %c0_31 = arith.constant 0 : index
      %c0_32 = arith.constant 0 : index
      %c0_33 = arith.constant 0 : index
      %41 = vector.load %arg8[%c0_31, %c0_32, %c0_33] : memref<1x1x32xf32, #tpu.memory_space<vmem>>, vector<1x1x32xf32>
      tpu.vector_store %arg8[%c0_31, %c0_32, %c0_33], %40 {strides = array<i32>} : memref<1x1x32xf32, #tpu.memory_space<vmem>>, vector<1x1x32xf32>,
      %cst_34 = arith.constant 0.000000e+00 : f32
      %42 = vector.broadcast %cst_34 : f32 to vector<1x1x1xf32>
      %c0_35 = arith.constant 0 : index
      %c0_36 = arith.constant 0 : index
      %c0_37 = arith.constant 0 : index
      %43 = vector.load %arg9[%c0_35, %c0_36, %c0_37] : memref<1x1x1xf32, #tpu.memory_space<vmem>>, vector<1x1x1xf32>
      tpu.vector_store %arg9[%c0_35, %c0_36, %c0_37], %42 {strides = array<i32>} : memref<1x1x1xf32, #tpu.memory_space<vmem>>, vector<1x1x1xf32>,
    } else {
    }
    %c0 = arith.constant 0 : index
    %c0_1 = arith.constant 0 : index
    %c0_2 = arith.constant 0 : index
    %3 = vector.load %arg2[%c0, %c0_1, %c0_2] : memref<1x8x32xbf16, #tpu.memory_space<vmem>>, vector<1x8x32xbf16>
    %4 = vector.shape_cast %3 : vector<1x8x32xbf16> to vector<8x32xbf16>
    %c0_3 = arith.constant 0 : index
    %c0_4 = arith.constant 0 : index
    %5 = vector.load %arg4[%c0_3, %c0_4] : memref<32x32xbf16, #tpu.memory_space<vmem>>, vector<32x32xbf16>
    %cst = arith.constant dense<0.000000e+00> : vector<8x32xf32>
    %6 = tpu.matmul %4, %5, %cst {dimension_numbers = #tpu.dot_dimension_numbers<[1], [0], [0], [1], [0, 0, 1, 1], [], []>} : vector<8x32xbf16>, vector<32x32xbf16>, vector<8x32xf32> -> vector<8x32xf32>
    %c0_5 = arith.constant 0 : index
    %c0_6 = arith.constant 0 : index
    %7 = vector.load %arg5[%c0_5, %c0_6] : memref<1x32xf32, #tpu.memory_space<vmem>>, vector<1x32xf32>
    %8 = vector.broadcast %7 : vector<1x32xf32> to vector<8x32xf32>
    %9 = arith.addf %6, %8 : vector<8x32xf32>
    %10 = math.tanh %9 : vector<8x32xf32>
    %11 = vector.shape_cast %10 : vector<8x32xf32> to vector<1x8x32xf32>
    %c0_7 = arith.constant 0 : index
    %c0_8 = arith.constant 0 : index
    %12 = vector.load %arg6[%c0_7, %c0_8] : memref<1x32xf32, #tpu.memory_space<vmem>>, vector<1x32xf32>
    %13 = vector.shape_cast %12 : vector<1x32xf32> to vector<1x1x32xf32>
    %14 = vector.broadcast %13 : vector<1x1x32xf32> to vector<1x8x32xf32>
    %15 = arith.mulf %11, %14 : vector<1x8x32xf32>
    %cst_9 = arith.constant dense<0.000000e+00> : vector<1x8xf32>
    %16 = vector.multi_reduction <add>, %15, %cst_9 [2] : vector<1x8x32xf32> to vector<1x8xf32>
    %17 = vector.shape_cast %16 : vector<1x8xf32> to vector<1x8x1xf32>
    %c0_10 = arith.constant 0 : index
    %c0_11 = arith.constant 0 : index
    %c0_12 = arith.constant 0 : index
    %18 = vector.load %arg3[%c0_10, %c0_11, %c0_12] : memref<1x8x1xf32, #tpu.memory_space<vmem>>, vector<1x8x1xf32>
    %c0_13 = arith.constant 0 : index
    %19 = memref.load %arg7[%c0_13] : memref<1xf32, #tpu.memory_space<smem>>
    %20 = vector.broadcast %19 : f32 to vector<1x8x1xf32>
    %21 = arith.addf %17, %20 : vector<1x8x1xf32>
    %22 = math.exp %21 : vector<1x8x1xf32>
    %23 = arith.mulf %22, %18 : vector<1x8x1xf32>
    %c0_14 = arith.constant 0 : index
    %c0_15 = arith.constant 0 : index
    %c0_16 = arith.constant 0 : index
    %24 = vector.load %arg9[%c0_14, %c0_15, %c0_16] : memref<1x1x1xf32, #tpu.memory_space<vmem>>, vector<1x1x1xf32>
    %cst_17 = arith.constant dense<0.000000e+00> : vector<1x1xf32>
    %25 = vector.multi_reduction <add>, %23, %cst_17 [1] : vector<1x8x1xf32> to vector<1x1xf32>
    %26 = vector.shape_cast %25 : vector<1x1xf32> to vector<1x1x1xf32>
    %27 = arith.addf %24, %26 : vector<1x1x1xf32>
    %c0_18 = arith.constant 0 : index
    %c0_19 = arith.constant 0 : index
    %c0_20 = arith.constant 0 : index
    %28 = vector.load %arg9[%c0_18, %c0_19, %c0_20] : memref<1x1x1xf32, #tpu.memory_space<vmem>>, vector<1x1x1xf32>
    tpu.vector_store %arg9[%c0_18, %c0_19, %c0_20], %27 {strides = array<i32>} : memref<1x1x1xf32, #tpu.memory_space<vmem>>, vector<1x1x1xf32>,
    %c0_21 = arith.constant 0 : index
    %c0_22 = arith.constant 0 : index
    %c0_23 = arith.constant 0 : index
    %29 = vector.load %arg8[%c0_21, %c0_22, %c0_23] : memref<1x1x32xf32, #tpu.memory_space<vmem>>, vector<1x1x32xf32>
    %30 = arith.extf %3 : vector<1x8x32xbf16> to vector<1x8x32xf32>
    %31 = vector.broadcast %23 : vector<1x8x1xf32> to vector<1x8x32xf32>
    %32 = arith.mulf %31, %30 : vector<1x8x32xf32>
    %cst_24 = arith.constant dense<0.000000e+00> : vector<1x32xf32>
    %33 = vector.multi_reduction <add>, %32, %cst_24 [1] : vector<1x8x32xf32> to vector<1x32xf32>
    %34 = vector.shape_cast %33 : vector<1x32xf32> to vector<1x1x32xf32>
    %35 = arith.addf %29, %34 : vector<1x1x32xf32>
    %c0_25 = arith.constant 0 : index
    %c0_26 = arith.constant 0 : index
    %c0_27 = arith.constant 0 : index
    %36 = vector.load %arg8[%c0_25, %c0_26, %c0_27] : memref<1x1x32xf32, #tpu.memory_space<vmem>>, vector<1x1x32xf32>
    tpu.vector_store %arg8[%c0_25, %c0_26, %c0_27], %35 {strides = array<i32>} : memref<1x1x32xf32, #tpu.memory_space<vmem>>, vector<1x1x32xf32>,
    %c0_i32_28 = arith.constant 0 : i32
    %37 = arith.cmpi eq, %arg1, %c0_i32_28 : i32
    %38 = arith.extui %37 : i1 to i32
    %c0_i32_29 = arith.constant 0 : i32
    %39 = arith.cmpi ne, %38, %c0_i32_29 : i32
    scf.if %39 {
      %c0_30 = arith.constant 0 : index
      %c0_31 = arith.constant 0 : index
      %c0_32 = arith.constant 0 : index
      %40 = vector.load %arg8[%c0_30, %c0_31, %c0_32] : memref<1x1x32xf32, #tpu.memory_space<vmem>>, vector<1x1x32xf32>
      %c0_33 = arith.constant 0 : index
      %c0_34 = arith.constant 0 : index
      %c0_35 = arith.constant 0 : index
      %41 = vector.load %arg9[%c0_33, %c0_34, %c0_35] : memref<1x1x1xf32, #tpu.memory_space<vmem>>, vector<1x1x1xf32>
      %cst_36 = arith.constant 9.99999993E-9 : f32
      %42 = vector.broadcast %cst_36 : f32 to vector<1x1x1xf32>
      %43 = arith.addf %41, %42 : vector<1x1x1xf32>
      %44 = tpu.reciprocal %43 {approx = true} : vector<1x1x1xf32> -> vector<1x1x1xf32>
      %45 = vector.broadcast %44 : vector<1x1x1xf32> to vector<1x1x32xf32>
      %46 = arith.mulf %40, %45 : vector<1x1x32xf32>
      %c0_37 = arith.constant 0 : index
      %c0_38 = arith.constant 0 : index
      %c0_39 = arith.constant 0 : index
      %47 = vector.load %arg8[%c0_37, %c0_38, %c0_39] : memref<1x1x32xf32, #tpu.memory_space<vmem>>, vector<1x1x32xf32>
      tpu.vector_store %arg8[%c0_37, %c0_38, %c0_39], %46 {strides = array<i32>} : memref<1x1x32xf32, #tpu.memory_space<vmem>>, vector<1x1x32xf32>,
    } else {
    }
    return
  }
  func.func @transform_0(%arg0: i32, %arg1: i32) -> (i32, i32, i32) {
    %c0_i32 = arith.constant 0 : i32
    %c0_i32_0 = arith.constant 0 : i32
    return %arg0, %arg1, %c0_i32 : i32, i32, i32
  }
  func.func @transform_1(%arg0: i32, %arg1: i32) -> (i32, i32, i32) {
    %c0_i32 = arith.constant 0 : i32
    %c0_i32_0 = arith.constant 0 : i32
    return %arg0, %arg1, %c0_i32 : i32, i32, i32
  }
  func.func @transform_2(%arg0: i32, %arg1: i32) -> (i32, i32) {
    %c0_i32 = arith.constant 0 : i32
    %c0_i32_0 = arith.constant 0 : i32
    %c0_i32_1 = arith.constant 0 : i32
    return %c0_i32, %c0_i32_0 : i32, i32
  }
  func.func @transform_3(%arg0: i32, %arg1: i32) -> (i32, i32) {
    %c0_i32 = arith.constant 0 : i32
    %c0_i32_0 = arith.constant 0 : i32
    %c0_i32_1 = arith.constant 0 : i32
    return %c0_i32, %c0_i32_0 : i32, i32
  }
  func.func @transform_4(%arg0: i32, %arg1: i32) -> (i32, i32) {
    %c0_i32 = arith.constant 0 : i32
    %c0_i32_0 = arith.constant 0 : i32
    %c0_i32_1 = arith.constant 0 : i32
    return %c0_i32, %c0_i32_0 : i32, i32
  }
  func.func @transform_5(%arg0: i32, %arg1: i32) -> i32 {
    %c0_i32 = arith.constant 0 : i32
    %c0_i32_0 = arith.constant 0 : i32
    return %c0_i32 : i32
  }
  func.func @transform_6(%arg0: i32, %arg1: i32) -> (i32, i32, i32) {
    %c0_i32 = arith.constant 0 : i32
    %c0_i32_0 = arith.constant 0 : i32
    %c0_i32_1 = arith.constant 0 : i32
    return %arg0, %c0_i32, %c0_i32_0 : i32, i32, i32
  }
}

</mosaic_0001>

<bundles_post_ra>
// kernel: tpu_custom_call.1
= control target key start
LH: loop header
LB: loop body
LE: loop exit
PB: predicated region body
PF: predicated region fallthrough
CT: control target
= control target key end

     0   :  { %s1075_s0 = inlined_call_operand.hbm [shape: bf16[2,8,32], index: 0, kind: input, shape index: {}]   ;;  %s1076_s1 = inlined_call_operand.vmem [shape: f32[2,1,8], index: 1, kind: input, shape index: {}]   ;;  %s1077_s2 = inlined_call_operand.hbm [shape: bf16[32,32], index: 2, kind: input, shape index: {}]   ;;  %s1078_s3 = inlined_call_operand.vmem [shape: f32[1,32], index: 3, kind: input, shape index: {}]   ;;  %s1079_s4 = inlined_call_operand.vmem [shape: f32[1,32], index: 4, kind: input, shape index: {}]   ;;  %s1080_s5 = inlined_call_operand.<no memory space> [shape: f32[1], index: 5, kind: input, shape index: {}]   ;;  %s1081_s6 = inlined_call_operand.hbm [shape: f32[2,1,32], index: 6, kind: output, shape index: {}]  }
   0x1   :  { %1084 = sst [smem:[#allocation14_spill]] %s1077_s2 }
   0x2   :  { %11 = sst [smem:[#allocation3]] %s1080_s5 }
   0x3   :  { %12 = vsyncpa [#allocation5], 0 }
   0x4   :  { %14 = vsyncpa [#allocation5 + $0x1], 0 }
   0x5   :  { %15 = vsyncpa [#allocation8], 0 }
   0x6   :  { %16 = vsyncpa [#allocation6], 0 }
   0x7   :  { %18 = vsyncpa [#allocation6 + $0x1], 0  ;;  %s880_s23 = smov 0   ;;  %s882_s24 = smov 0  }
   0x8   :  { %s884_s25 = smov 0   ;;  %s886_s26 = smov 0  }
   0x9   :  { %s888_s27 = smov 0   ;;  %s890_s28 = smov 0  }
   0xa LB: > { %s576_s5 = sadd.s32 4294967295, %s832_s28   ;;  %s577_s29 = sadd.s32 4294967294, %s832_s28   ;;  %s832_s28 = sphi %s890_s28, %s24_s28   ;;  %s828_s27 = sphi %s888_s27, %s1104_s27   ;;  %s824_s26 = sphi %s886_s26, %s1103_s26   ;;  %s820_s25 = sphi %s884_s25, %s1102_s25   ;;  %s816_s24 = sphi %s882_s24, %s1101_s24   ;;  %s812_s23 = sphi %s880_s23, %s1100_s23  }
   0xb   : > { %p58_p0 = scmp.ne.s32.totalorder %s816_s24, %s812_s23  ;;  %p914_p1 = scmp.eq.s32.totalorder %s576_s5, 0 }
   0xc   : > { %p918_p2 = scmp.eq.s32.totalorder %s576_s5, 1  ;;  %p200_p3 = scmp.eq.s32.totalorder %s577_s29, 1 }
   0xd   : > { %p924_p4 = por %p914_p1, %p58_p0  ;;  %p578_p5 = scmp.ge.s32.totalorder %s832_s28, 1 }
   0xe   : > { %p929_p6 = por %p200_p3, %p58_p0  ;;  %p207_p7 = scmp.lt.s32.totalorder %s832_s28, 3 }
   0xf   : > { %s1087_s8 = scalar_select %p924_p4, 1, 0 }
  0x10   : > { %s1088_s9 = scalar_select %p929_p6, 1, 0 }
  0x11   : > { %p934_p8 = pnand %p578_p5, %p207_p7  ;;  %s834_s11 = smov [#allocation7]  }
  0x12   : > { %s219_s12 = sshll.u32 %s834_s11, 4  ;;  %s36_s14 = sadd.s32 1, %s828_s27  ;;  %s220_s12 = int_to_ptr.vmem [resolvable:$true] %s219_s12 }
  0x13   : > { %p614_p9 = pneg %p934_p8  ;;  %s705_s15 = scalar_lea.vmem %s220_s12, 256 }
  0x14   : > { %p706_p13 = scmp.ne.s32.totalorder %s220_s12, %s705_s15  ;;  %p713_p5 = scmp.lt.s32.totalorder %s220_s12, %s220_s12 }
  0x15   : > { %p943_p11 = pnand %p614_p9, %p914_p1  ;;  %p714_p7 = scmp.lt.s32.totalorder %s705_s15, %s705_s15 }
  0x17   : > { %p696_p12 = pneg %p943_p11  ;;  %p715_p6 = por %p714_p7, %p713_p5 }
  0x19   : > { %p708_p0 = pnand %p706_p13, %p696_p12 }
  0x1b   : > { %p709_p3 = pneg %p708_p0 }
  0x1d   : > { %p716_p4 = pnand %p715_p6, %p709_p3 }
  0x1f   : > { %719 = shalt.err (!%p716_p4)
}
  0x20   : > { %s835_s16 = smov 64   ;;  %s836_s17 = smov 4  }
  0x21   : > { %s1091_s2 = sld [smem:[#allocation14_spill]]  ;;  %p38_p6 = scmp.ge.s32.totalorder %s36_s14, 2 }
  0x22   : > { %s45_s20 = sadd.s32 1, %s820_s25  ;;  %p52_p4 = scmp.ne.s32.totalorder %s820_s25, %s816_s24 }
  0x23   : > { %p53_p9 = scmp.eq.s32.totalorder %s832_s28, 0  ;;  %s1106_s14 = smov (%p38_p6, %s36_s14), 0 }
  0x24   : > { %1092 = sst [smem:[#allocation13_spill]] %s1106_s14  ;;  %p967_p13 = por %p918_p2, %p52_p4 }
  0x25   : > { %p961_p12 = por %p53_p9, %p52_p4  ;;  %s40_s5 = ssub.s32 %s828_s27, %s1106_s14 }
  0x26   : > { %p627_p0 = scmp.lt.s32.totalorder %s832_s28, 2  ;;  %s242_s29 = sand.u32 1, %s820_s25  }
  0x27   : > { %617 = dma.hbm_to_vmem [thread:$0]  (!%p943_p11), %s1091_s2, 256, %s220_s12, [#allocation8], %s835_s16, %s835_s16, %s836_s17  }
  0x28   : > { %p43_p11 = scmp.eq.s32.totalorder %s40_s5, 0  ;;  %s581_s11 = sshll.u32 %s242_s29, 2 }
  0x29   : > { %s582_s13 = sshll.u32 %s828_s27, 6  ;;  %s246_s18 = scalar_lea.vmem [#allocation4], %s581_s11 }
  0x2a   : > { %s976_s12 = scalar_select %p43_p11, %s820_s25, %s45_s20  }
  0x2b   : > { %s252_s17 = scalar_lea.hbm %s1075_s0, %s582_s13  ;;  %s254_s19 = sshll.u32 %s246_s18, 4  ;;  %s255_s19 = int_to_ptr.vmem [resolvable:$true] %s254_s19 }
  0x2c   : > { %p984_p2 = pnand %p627_p0, %p961_p12  ;;  %s243_s2 = scalar_lea.sflag [#allocation5], %s242_s29 }
  0x2d   : > { %s733_s5 = scalar_lea.vmem %s255_s19, 64  ;;  %s837_s20 = smov [#allocation4]  }
  0x2e   : > { %p722_p3 = pneg %p984_p2  ;;  %p734_p5 = scmp.ne.s32.totalorder %s255_s19, %s733_s5 }
  0x2f   : > { %s738_s14 = sshll.u32 %s837_s20, 4  ;;  %s739_s14 = int_to_ptr.vmem [resolvable:$false] %s738_s14 }
  0x30   : > { %p736_p7 = pnand %p734_p5, %p722_p3  ;;  %s740_s13 = scalar_lea.vmem %s739_s14, 128 }
  0x31   : > { %p741_p4 = scmp.lt.s32.totalorder %s255_s19, %s739_s14  ;;  %p742_p9 = scmp.lt.s32.totalorder %s740_s13, %s733_s5 }
  0x32   : > { %p737_p6 = pneg %p736_p7 }
  0x33   : > { %p743_p11 = por %p742_p9, %p741_p4 }
  0x35   : > { %p744_p10 = pnand %p743_p11, %p737_p6 }
  0x37   : > { %747 = shalt.err (!%p744_p10)
}
  0x38   : > { %621 = dma.hbm_to_vmem [thread:$0]  (!%p984_p2), %s252_s17, 64, %s255_s19, %s243_s2  }
  0x39   : > { %272 = sbr.rel (%p934_p8) target bundleno = 623 (0x26f), region = 44  ;;  %s995_s21 = sand.u32 (!%p934_p8), 1, %s816_s24  }
  0x3a   : > { %s584_s29 = sshll.u32 (!%p934_p8), %s995_s21, 2  ;;  %s275_s11 = scalar_lea.sflag (!%p934_p8), [#allocation5], %s995_s21 }
  0x3b   : > { %s278_s15 = scalar_lea.vmem (!%p934_p8), [#allocation4], %s584_s29  ;;  %p1096_p12 = scmp.ne.s32.totalorder (!%p934_p8), %s1087_s8, 0 }
  0x3e   : > { %799 = dma.done.wait (%p1096_p12), %s275_s11, 64  }
  0x3f   : > { %801 = vsyncadd (%p1096_p12), %s275_s11, 4294967232 }
  0x40   : > { %803 = dma.done.wait (%p914_p1), [#allocation8], 256  }
  0x41   : > { %805 = vsyncadd (%p914_p1), [#allocation8], 4294967040  ;;  %vm327_vm0 = vcmask 253952   ;;  %vm329_vm1 = vcmask 0   ;;  %s1008_s2 = scalar_lea.vmem [#allocation9], %s995_s21  ;;  %v838_v0 = vmov 0.0   ;;  %v460_v45 = vlaneseq }
  0x42   : > { %328 = vst.msk [vmem:[%s1008_s2] sm:$0x1] %vm327_vm0, %v838_v0  ;;  %598 = vmatprep.subr.bf16.mxu0 %v838_v0  ;;  %vm839_vm2 = vmmov 0   ;;  %v686_v1 = vld [vmem:[#allocation7 + $0x8] sm:$0xff]   ;;  %v687_v2 = vld [vmem:[#allocation7] sm:$0xff]   ;;  %vm355_vm3 = vcmask 261120  }
  0x43   : > { %330 = vst.msk [vmem:[#allocation2] sm:$0x1] %vm329_vm1, %v838_v0  ;;  %602 = vmatprep.mubr.msk.bf16.mxu0 %vm839_vm2, %v838_v0  ;;  %599 = vmatpush3.bf16.msra.mxu0 %v686_v1  ;;  %v331_v3 = vld [vmem:[%s278_s15] sm:$0xf]  ;;  %v586_v4 = vld [vmem:[%s1078_s3] ss:$0 sm:$0xff] }
  0x44   : > { %600 = vmatprep.subr.bf16.mxu0 %v838_v0  ;;  %v590_v10 = vld [vmem:[%s1079_s4] ss:$0 sm:$0xff]  ;;  %p316_p1 = scmp.lt.s32.totalorder %s824_s26, 1  ;;  %v840_v15 = vmov 0   ;;  %s419_s7 = sld [smem:[#allocation3]]  ;;  %v436_v21 = vunpack.c.l.bf16 %v331_v3  ;;  %v461_v46 = vshrl.u32 %v460_v45, 7 }
  0x45   : > { %684 = vset.pattern.permute.xlu1 %v840_v15  ;;  %685 = vset.pattern.permute.xlu0 %v840_v15  ;;  %s592_s5 = sshll.u32 %s824_s26, 4  ;;  %s479_s20 = sshll.u32 %s1008_s2, 4  ;;  %s480_s20 = int_to_ptr.vmem [resolvable:$true] %s479_s20 }
  0x46   : > { %s317_s16 = scalar_select %p316_p1, %s824_s26, 1  ;;  %v462_v47 = vsub.s32 0, %v461_v46 }
  0x47   : > { %601 = vmatpush3.bf16.msra.mxu0 %v687_v2  ;;  %s477_s11 = scalar_lea.hbm %s1081_s6, %s592_s5  ;;  %s467_s15 = scalar_lea.sflag [#allocation6], %s995_s21 }
  0x48   : > { %s321_s19 = scalar_lea.vmem %s1076_s1, %s317_s16  ;;  %s748_s30 = scalar_lea.vmem %s480_s20, 16 }
  0x49   : > { %v591_v14 = vld [vmem:[%s321_s19] ss:$0 sm:$0xff]  ;;  %p749_p8 = scmp.ne.s32.totalorder %s480_s20, %s748_s30  ;;  %s841_s8 = smov [#allocation9]  }
  0x4a   : > { %603 = vmatmul.mubr.msk.bf16.vlgmr.msra.gmra.mxu0 %vm355_vm3, %v331_v3  ;;  %v420_v16 = vstv %s419_s7  ;;  %v425_v34 = vld [vmem:[#allocation2] sm:$0x1]  ;;  %s752_s10 = sshll.u32 %s841_s8, 4  ;;  %s753_s10 = int_to_ptr.vmem [resolvable:$false] %s752_s10 }
  0x4b   : > { %v435_v39 = vld [vmem:[%s1008_s2] sm:$0x1]  ;;  %p750_p10 = pnand %p749_p8, %p967_p13  ;;  %s754_s26 = scalar_lea.vmem %s753_s10, 32 }
  0x4c   : > { %p755_p2 = scmp.lt.s32.totalorder %s480_s20, %s753_s10  ;;  %p756_p3 = scmp.lt.s32.totalorder %s754_s26, %s748_s30 }
  0x4d   : > { %p751_p0 = pneg %p750_p10 }
  0x4e   : > { %p757_p5 = por %p756_p3, %p755_p2 }
  0x50   : > { %p758_p7 = pnand %p757_p5, %p751_p0 }
 0x10a   : > { %v393_v5 = vpop.f32.mrf.mxu0 }
 0x10b   : > { %v394_v6 = vadd.f32 %v586_v4, %v393_v5 }
 0x10c   : > { %v604_v7 = vpop.f32.mrf.mxu0 }
 0x10d   : > { %688 = vtanh.f32 %v394_v6 }
 0x10e   : > { %v396_v8 = vpop.f32.mrf.mxu0 }
 0x110   : > { %v605_v9 = vpop.f32.mrf.mxu0 }
 0x11a   : > { %v689_v11 = vpop.eup %688 }
 0x11b   : > { %v407_v12 = vmul.f32 %v689_v11, %v590_v10 }
 0x11d   : > { %v408_v13 = vsel %vm355_vm3, %v407_v12, 0.0 }
 0x11e   : > { %409 = vadd.xlane.f32.xlu0 %v408_v13 }
 0x134   : > { %417 = vbcast.lane.b32.xlu0 %v591_v14, 256 }
 0x1a7   : > { %v410_v17 = vpop.xlane.xlu0 %409 }
 0x1a8   : > { %v421_v18 = vadd.f32 %v420_v16, %v410_v17 }
 0x1aa   : > { %v422_v19 = vmul.f32 1.442695, %v421_v18 }
 0x1ab   : > { %v418_v20 = vpop.permute.xlu0 %417 }
 0x1ac   : > { %690 = vpow2.f32 %v422_v19 }
 0x1b9   : > { %v691_v22 = vpop.eup %690 }
 0x1ba   : > { %v424_v23 = vmul.f32 %v691_v22, %v418_v20 }
 0x1bc   : > { %v426_v24 = vrot.slane %v424_v23, 4  ;;  %v437_v25 = vmul.f32 %v436_v21, %v424_v23 }
 0x1be   : > { %v427_v26 = vadd.f32 %v426_v24, %v424_v23  ;;  %v438_v27 = vsel %vm355_vm3, %v437_v25, 0.0 }
 0x1bf   : > { %v439_v28 = vrot.slane %v438_v27, 4 }
 0x1c0   : > { %v428_v29 = vrot.slane %v427_v26, 2 }
 0x1c1   : > { %v440_v30 = vadd.f32 %v439_v28, %v438_v27 }
 0x1c2   : > { %v429_v31 = vadd.f32 %v428_v29, %v427_v26 }
 0x1c3   : > { %v441_v32 = vrot.slane %v440_v30, 2 }
 0x1c4   : > { %v430_v33 = vrot.slane %v429_v31, 1 }
 0x1c5   : > { %v442_v35 = vadd.f32 %v441_v32, %v440_v30 }
 0x1c6   : > { %v431_v36 = vadd.f32 %v430_v33, %v429_v31 }
 0x1c7   : > { %v443_v37 = vrot.slane %v442_v35, 1 }
 0x1c8   : > { %v432_v38 = vadd.f32 %v431_v36, %v425_v34 }
 0x1c9   : > { %v444_v40 = vadd.f32 %v443_v37, %v442_v35 }
 0x1ca   : > { %434 = vst.msk [vmem:[#allocation2] sm:$0x1] %vm329_vm1, %v432_v38 }
 0x1cb   : > { %v445_v41 = vadd.f32 %v444_v40, %v435_v39 }
 0x1cd   : > { %447 = vst.msk [vmem:[%s1008_s2] sm:$0x1] %vm327_vm0, %v445_v41 }
 0x1d1   : > { %v452_v42 = vld [vmem:[#allocation2] sm:$0x1] }
 0x1d2   : > { %v453_v43 = vadd.f32 1e-08, %v452_v42 }
 0x1d4   : > { %692 = vrcp.f32 %v453_v43  ;;  %v451_v50 = vld [vmem:[%s1008_s2] sm:$0x1] }
 0x1e1   : > { %v693_v44 = vpop.eup %692 }
 0x1e2   : > { %457 = vperm.xlu1 %684, %v693_v44  }
 0x25d   : > { %v458_v48 = vpop.permute.xlu1 %457 }
 0x25e   : > { %v463_v49 = vrot.slane %v458_v48, %v462_v47 }
 0x260   : > { %v464_v51 = vmul.f32 %v463_v49, %v451_v50 }
 0x262   : > { %465 = vst.msk [vmem:[%s1008_s2] sm:$0x1] %vm327_vm0, %v464_v51 }
 0x263   : > { %761 = shalt.err (!%p758_p7)
}
 0x264   : > { %s762_s14 = scalar_lea.hbm %s477_s11, 16  ;;  %s766_s16 = scalar_lea.hbm %s1081_s6, 32 }
 0x265   : > { %p763_p6 = scmp.ne.s32.totalorder %s477_s11, %s762_s14  ;;  %p767_p11 = scmp.lt.s32.totalorder %s477_s11, %s1081_s6 }
 0x266   : > { %p768_p12 = scmp.lt.s32.totalorder %s766_s16, %s762_s14 }
 0x267   : > { %p764_p4 = pnand %p763_p6, %p967_p13 }
 0x268   : > { %p769_p1 = por %p768_p12, %p767_p11 }
 0x269   : > { %p765_p9 = pneg %p764_p4 }
 0x26b   : > { %p770_p8 = pnand %p769_p1, %p765_p9 }
 0x26d   : > { %773 = shalt.err (!%p770_p8)
}
 0x26e   : > { %612 = dma.vmem_to_hbm [thread:$0]  (%p967_p13), %s480_s20, 16, %s477_s11, %s467_s15  }
 0x26f PF: > { %s491_s19 = sand.u32 1, %s812_s23   ;;  %p1097_p10 = scmp.ne.s32.totalorder %s1088_s9, 0 }
 0x270   : > { %p1098_p0 = scmp.ge.s32.totalorder %s832_s28, 2  ;;  %s492_s7 = scalar_lea.sflag [#allocation6], %s491_s19 }
 0x272   : > { %p623_p2 = pnand %p1098_p0, %p1097_p10 }
 0x274   : > { %p624_p3 = pneg %p623_p2 }
 0x276   : > { %807 = dma.done.wait (%p624_p3), %s492_s7, 16  }
 0x277   : > { %809 = vsyncadd (%p624_p3), %s492_s7, 4294967280  ;;  %s24_s28 = sadd.s32 1, %s832_s28   ;;  %s1099_s22 = sld [smem:[#allocation13_spill]] }
 0x278   : > { %p21_p5 = scmp.ge.s32.totalorder %s24_s28, 4   ;;  %s1100_s23 = smov %s816_s24 }
 0x279   : > { %s1101_s24 = smov %s820_s25  ;;  %s1102_s25 = smov %s976_s12 }
 0x27a   : > { %s1103_s26 = smov %s828_s27  ;;  %23 = sbr.rel (!%p21_p5) target bundleno = 10 (0xa), region = 104 }
 0x27d   : > { %s1104_s27 = smov %s1099_s22 }
 0x27f   :  { %496 = vsyncpa [#allocation5], 1 }
 0x280   :  { %498 = vsyncpa [#allocation5 + $0x1], 1 }
 0x281   :  { %499 = vsyncpa [#allocation8], 1 }
 0x282   :  { %500 = vsyncpa [#allocation6], 1 }
 0x283   :  { %502 = vsyncpa [#allocation6 + $0x1], 1 }

// kernel: tpu_custom_call.1
= control target key start
LH: loop header
LB: loop body
LE: loop exit
PB: predicated region body
PF: predicated region fallthrough
CT: control target
= control target key end

     0   :  { %s981_s0 = inlined_call_operand.hbm [shape: bf16[2,8,32], index: 0, kind: input, shape index: {}]   ;;  %s982_s1 = inlined_call_operand.vmem [shape: f32[2,8,1], index: 1, kind: input, shape index: {}]   ;;  %s983_s2 = inlined_call_operand.vmem [shape: bf16[32,32], index: 2, kind: input, shape index: {}]   ;;  %s984_s3 = inlined_call_operand.vmem [shape: f32[1,32], index: 3, kind: input, shape index: {}]   ;;  %s985_s4 = inlined_call_operand.vmem [shape: f32[1,32], index: 4, kind: input, shape index: {}]   ;;  %s986_s5 = inlined_call_operand.<no memory space> [shape: f32[1], index: 5, kind: input, shape index: {}]   ;;  %s987_s6 = inlined_call_operand.hbm [shape: f32[2,1,32], index: 6, kind: output, shape index: {}]  }
   0x1   :  { %11 = sst [smem:[#allocation3]] %s986_s5 }
   0x2   :  { %12 = vsyncpa [#allocation5], 0 }
   0x3   :  { %14 = vsyncpa [#allocation5 + $0x1], 0 }
   0x4   :  { %15 = vsyncpa [#allocation6], 0 }
   0x5   :  { %17 = vsyncpa [#allocation6 + $0x1], 0  ;;  %s813_s23 = smov 0   ;;  %s815_s24 = smov 0  }
   0x6   :  { %s817_s25 = smov 0   ;;  %s819_s26 = smov 0  }
   0x7   :  { %s821_s27 = smov 0   ;;  %s823_s28 = smov 0  }
   0x8 LB: > { %s557_s5 = sadd.s32 4294967295, %s768_s28   ;;  %s558_s29 = sadd.s32 4294967294, %s768_s28   ;;  %s768_s28 = sphi %s823_s28, %s23_s28   ;;  %s764_s27 = sphi %s821_s27, %s999_s27   ;;  %s760_s26 = sphi %s819_s26, %s998_s26   ;;  %s756_s25 = sphi %s817_s25, %s997_s25   ;;  %s752_s24 = sphi %s815_s24, %s996_s24   ;;  %s748_s23 = sphi %s813_s23, %s995_s23  }
   0x9   : > { %s35_s30 = sadd.s32 1, %s764_s27  ;;  %s44_s7 = sadd.s32 1, %s756_s25 }
   0xa   : > { %p37_p0 = scmp.ge.s32.totalorder %s35_s30, 2  ;;  %p51_p1 = scmp.ne.s32.totalorder %s756_s25, %s752_s24 }
   0xb   : > { %p52_p2 = scmp.eq.s32.totalorder %s768_s28, 0  ;;  %p57_p3 = scmp.ne.s32.totalorder %s752_s24, %s748_s23 }
   0xc   : > { %s1001_s30 = smov (%p37_p0, %s35_s30), 0  ;;  %p58_p5 = scmp.eq.s32.totalorder %s557_s5, 0 }
   0xd   : > { %p854_p4 = por %p52_p2, %p51_p1  ;;  %s39_s9 = ssub.s32 %s764_s27, %s1001_s30 }
   0xe   : > { %p193_p6 = scmp.eq.s32.totalorder %s557_s5, 1  ;;  %p42_p7 = scmp.eq.s32.totalorder %s39_s9, 0 }
   0xf   : > { %p860_p8 = por %p58_p5, %p57_p3  ;;  %p199_p10 = scmp.eq.s32.totalorder %s558_s29, 1 }
  0x10   : > { %p864_p9 = por %p193_p6, %p51_p1  ;;  %p597_p13 = scmp.lt.s32.totalorder %s768_s28, 2 }
  0x11   : > { %s869_s12 = scalar_select %p42_p7, %s756_s25, %s44_s7  }
  0x12   : > { %p871_p11 = por %p199_p10, %p57_p3  ;;  %s231_s14 = sand.u32 1, %s756_s25  }
  0x13   : > { %s561_s15 = sshll.u32 %s231_s14, 2  ;;  %s562_s16 = sshll.u32 %s764_s27, 6 }
  0x14   : > { %s991_s13 = scalar_select %p871_p11, 1, 0 }
  0x15   : > { %s241_s19 = scalar_lea.hbm %s981_s0, %s562_s16  ;;  %s235_s20 = scalar_lea.vmem [#allocation4], %s561_s15 }
  0x16   : > { %s243_s21 = sshll.u32 %s235_s20, 4  ;;  %p884_p0 = pnand %p597_p13, %p854_p4  ;;  %s244_s21 = int_to_ptr.vmem [resolvable:$true] %s243_s21 }
  0x17   : > { %p563_p1 = scmp.ge.s32.totalorder %s768_s28, 1  ;;  %p258_p2 = scmp.lt.s32.totalorder %s768_s28, 3 }
  0x18   : > { %s232_s5 = scalar_lea.sflag [#allocation5], %s231_s14  ;;  %p662_p3 = pneg %p884_p0 }
  0x19   : > { %s673_s29 = scalar_lea.vmem %s244_s21, 64  ;;  %s770_s7 = smov [#allocation4]  }
  0x1a   : > { %p674_p5 = scmp.ne.s32.totalorder %s244_s21, %s673_s29  ;;  %s678_s9 = sshll.u32 %s770_s7, 4  ;;  %s679_s9 = int_to_ptr.vmem [resolvable:$false] %s678_s9 }
  0x1b   : > { %s680_s15 = scalar_lea.vmem %s679_s9, 128  ;;  %p681_p10 = scmp.lt.s32.totalorder %s244_s21, %s679_s9 }
  0x1c   : > { %p676_p6 = pnand %p674_p5, %p662_p3  ;;  %p682_p12 = scmp.lt.s32.totalorder %s680_s15, %s673_s29 }
  0x1e   : > { %p677_p7 = pneg %p676_p6  ;;  %p683_p4 = por %p682_p12, %p681_p10 }
  0x20   : > { %p684_p13 = pnand %p683_p4, %p677_p7 }
  0x22   : > { %687 = shalt.err (!%p684_p13)
}
  0x23   : > { %592 = dma.hbm_to_vmem [thread:$0]  (!%p884_p0), %s241_s19, 64, %s244_s21, %s232_s5  }
  0x24   : > { %p259_p11 = pnand %p563_p1, %p258_p2 }
  0x25   : > { %s899_s8 = sand.u32 (!%p259_p11), 1, %s752_s24  }
  0x26   : > { %262 = sbr.rel (%p259_p11) target bundleno = 603 (0x25b), region = 44  ;;  %s564_s14 = sshll.u32 (!%p259_p11), %s899_s8, 2 }
  0x27   : > { %s265_s16 = scalar_lea.sflag (!%p259_p11), [#allocation5], %s899_s8  ;;  %s268_s17 = scalar_lea.vmem (!%p259_p11), [#allocation4], %s564_s14 }
  0x2b   : > { %739 = dma.done.wait (%p860_p8), %s265_s16, 64  }
  0x2c   : > { %741 = vsyncadd (%p860_p8), %s265_s16, 4294967232  ;;  %vm315_vm0 = vcmask 253952   ;;  %vm317_vm1 = vcmask 0   ;;  %s908_s18 = scalar_lea.vmem [#allocation7], %s899_s8  ;;  %v771_v0 = vmov 0.0   ;;  %vm772_vm2 = vmmov 0  }
  0x2d   : > { %316 = vst.msk [vmem:[%s908_s18] sm:$0x1] %vm315_vm0, %v771_v0  ;;  %577 = vmatprep.subr.bf16.mxu0 %v771_v0  ;;  %581 = vmatprep.mubr.msk.bf16.mxu0 %vm772_vm2, %v771_v0  ;;  %v652_v1 = vld [vmem:[%s983_s2 + $0x8] sm:$0xff]   ;;  %v653_v2 = vld [vmem:[%s983_s2] sm:$0xff]   ;;  %vm343_vm3 = vcmask 261120   ;;  %v773_v14 = vmov 0   ;;  %v448_v46 = vlaneseq }
  0x2e   : > { %318 = vst.msk [vmem:[#allocation2] sm:$0x1] %vm317_vm1, %v771_v0  ;;  %578 = vmatpush3.bf16.msra.mxu0 %v652_v1  ;;  %v319_v3 = vld [vmem:[%s268_s17] sm:$0xf]  ;;  %v566_v4 = vld [vmem:[%s984_s3] ss:$0 sm:$0xff]  ;;  %650 = vset.pattern.permute.xlu0 %v773_v14 }
  0x2f   : > { %579 = vmatprep.subr.bf16.mxu0 %v771_v0  ;;  %v570_v10 = vld [vmem:[%s985_s4] ss:$0 sm:$0xff]  ;;  %651 = vset.pattern.permute.xlu1 %v773_v14  ;;  %s400_s9 = sld [smem:[#allocation3]]  ;;  %p303_p8 = scmp.lt.s32.totalorder %s760_s26, 1  ;;  %vm407_vm4 = vcmask 7168   ;;  %v419_v34 = vunpack.c.l.bf16 %v319_v3  ;;  %v449_v47 = vshrl.u32 %v448_v46, 7 }
  0x30   : > { %s571_s20 = sshll.u32 %s760_s26, 4  ;;  %s467_s10 = sshll.u32 %s908_s18, 4  ;;  %s468_s10 = int_to_ptr.vmem [resolvable:$true] %s467_s10 }
  0x31   : > { %s304_s15 = scalar_select %p303_p8, %s760_s26, 1  ;;  %v450_v48 = vsub.s32 0, %v449_v47 }
  0x32   : > { %580 = vmatpush3.bf16.msra.mxu0 %v653_v2  ;;  %s465_s5 = scalar_lea.hbm %s987_s6, %s571_s20  ;;  %s455_s29 = scalar_lea.sflag [#allocation6], %s899_s8 }
  0x33   : > { %s565_s14 = sshll.u32 %s304_s15, 3  ;;  %s688_s7 = scalar_lea.vmem %s468_s10, 16 }
  0x34   : > { %s309_s19 = scalar_lea.vmem %s982_s1, %s565_s14  ;;  %v418_v43 = vld [vmem:[%s908_s18] sm:$0x1]  ;;  %p689_p11 = scmp.ne.s32.totalorder %s468_s10, %s688_s7 }
  0x35   : > { %582 = vmatmul.mubr.msk.bf16.vlgmr.msra.gmra.mxu0 %vm343_vm3, %v319_v3  ;;  %v401_v15 = vstv %s400_s9  ;;  %v399_v19 = vld [vmem:[%s309_s19] sm:$0xff]  ;;  %s774_s9 = smov [#allocation7]  }
  0x36   : > { %v406_v28 = vld [vmem:[#allocation2] sm:$0x1]  ;;  %p690_p12 = pnand %p689_p11, %p864_p9  ;;  %s692_s15 = sshll.u32 %s774_s9, 4  ;;  %s693_s15 = int_to_ptr.vmem [resolvable:$false] %s692_s15 }
  0x37   : > { %s694_s26 = scalar_lea.vmem %s693_s15, 32  ;;  %p695_p1 = scmp.lt.s32.totalorder %s468_s10, %s693_s15 }
  0x38   : > { %p691_p0 = pneg %p690_p12  ;;  %p696_p2 = scmp.lt.s32.totalorder %s694_s26, %s688_s7 }
  0x3a   : > { %p697_p3 = por %p696_p2, %p695_p1 }
  0x3c   : > { %p698_p5 = pnand %p697_p3, %p691_p0 }
  0xf5   : > { %v381_v5 = vpop.f32.mrf.mxu0 }
  0xf6   : > { %v382_v6 = vadd.f32 %v566_v4, %v381_v5 }
  0xf7   : > { %v583_v7 = vpop.f32.mrf.mxu0 }
  0xf8   : > { %654 = vtanh.f32 %v382_v6 }
  0xf9   : > { %v384_v8 = vpop.f32.mrf.mxu0 }
  0xfb   : > { %v584_v9 = vpop.f32.mrf.mxu0 }
 0x105   : > { %v655_v11 = vpop.eup %654 }
 0x106   : > { %v395_v12 = vmul.f32 %v655_v11, %v570_v10 }
 0x108   : > { %v396_v13 = vsel %vm343_vm3, %v395_v12, 0.0 }
 0x109   : > { %397 = vadd.xlane.f32.xlu0 %v396_v13 }
 0x192   : > { %v398_v16 = vpop.xlane.xlu0 %397 }
 0x193   : > { %v402_v17 = vadd.f32 %v401_v15, %v398_v16 }
 0x195   : > { %v403_v18 = vmul.f32 1.442695, %v402_v17 }
 0x197   : > { %656 = vpow2.f32 %v403_v18 }
 0x1a4   : > { %v657_v20 = vpop.eup %656 }
 0x1a5   : > { %v405_v21 = vmul.f32 %v657_v20, %v399_v19 }
 0x1a7   : > { %422 = vperm.xlu0 %650, %v405_v21   ;;  %v408_v22 = vsel %vm407_vm4, %v405_v21, 0.0 }
 0x1a8   : > { %v409_v23 = vrot.slane %v408_v22, 4 }
 0x1aa   : > { %v410_v24 = vadd.f32 %v409_v23, %v408_v22 }
 0x1ac   : > { %v411_v25 = vrot.slane %v410_v24, 2 }
 0x1ae   : > { %v412_v26 = vadd.f32 %v411_v25, %v410_v24 }
 0x1b0   : > { %v413_v27 = vrot.slane %v412_v26, 1 }
 0x1b2   : > { %v414_v29 = vadd.f32 %v413_v27, %v412_v26 }
 0x1b4   : > { %v415_v30 = vadd.f32 %v414_v29, %v406_v28 }
 0x1b6   : > { %417 = vst.msk [vmem:[#allocation2] sm:$0x1] %vm317_vm1, %v415_v30 }
 0x1bd   : > { %v440_v31 = vld [vmem:[#allocation2] sm:$0x1] }
 0x1be   : > { %v441_v32 = vadd.f32 1e-08, %v440_v31 }
 0x1c0   : > { %658 = vrcp.f32 %v441_v32 }
 0x1cd   : > { %v659_v33 = vpop.eup %658 }
 0x1ce   : > { %445 = vperm.xlu1 %651, %v659_v33  }
 0x222   : > { %v423_v35 = vpop.permute.xlu0 %422 }
 0x223   : > { %v425_v36 = vmul.f32 %v423_v35, %v419_v34 }
 0x225   : > { %v426_v37 = vsel %vm343_vm3, %v425_v36, 0.0 }
 0x226   : > { %v427_v38 = vrot.slane %v426_v37, 4 }
 0x228   : > { %v428_v39 = vadd.f32 %v427_v38, %v426_v37 }
 0x22a   : > { %v429_v40 = vrot.slane %v428_v39, 2 }
 0x22c   : > { %v430_v41 = vadd.f32 %v429_v40, %v428_v39 }
 0x22e   : > { %v431_v42 = vrot.slane %v430_v41, 1 }
 0x230   : > { %v432_v44 = vadd.f32 %v431_v42, %v430_v41 }
 0x232   : > { %v433_v45 = vadd.f32 %v432_v44, %v418_v43 }
 0x234   : > { %435 = vst.msk [vmem:[%s908_s18] sm:$0x1] %vm315_vm0, %v433_v45 }
 0x23b   : > { %v439_v51 = vld [vmem:[%s908_s18] sm:$0x1] }
 0x249   : > { %v446_v49 = vpop.permute.xlu1 %445 }
 0x24a   : > { %v451_v50 = vrot.slane %v446_v49, %v450_v48 }
 0x24c   : > { %v452_v52 = vmul.f32 %v451_v50, %v439_v51 }
 0x24e   : > { %453 = vst.msk [vmem:[%s908_s18] sm:$0x1] %vm315_vm0, %v452_v52 }
 0x24f   : > { %701 = shalt.err (!%p698_p5)
}
 0x250   : > { %s702_s14 = scalar_lea.hbm %s465_s5, 16  ;;  %s706_s16 = scalar_lea.hbm %s987_s6, 32 }
 0x251   : > { %p703_p6 = scmp.ne.s32.totalorder %s465_s5, %s702_s14  ;;  %p707_p4 = scmp.lt.s32.totalorder %s465_s5, %s987_s6 }
 0x252   : > { %p708_p13 = scmp.lt.s32.totalorder %s706_s16, %s702_s14 }
 0x253   : > { %p704_p7 = pnand %p703_p6, %p864_p9 }
 0x254   : > { %p709_p8 = por %p708_p13, %p707_p4 }
 0x255   : > { %p705_p10 = pneg %p704_p7 }
 0x257   : > { %p710_p11 = pnand %p709_p8, %p705_p10 }
 0x259   : > { %713 = shalt.err (!%p710_p11)
}
 0x25a   : > { %587 = dma.vmem_to_hbm [thread:$0]  (%p864_p9), %s468_s10, 16, %s465_s5, %s455_s29  }
 0x25b PF: > { %s479_s20 = sand.u32 1, %s748_s23   ;;  %p993_p12 = scmp.ne.s32.totalorder %s991_s13, 0 }
 0x25c   : > { %p994_p0 = scmp.ge.s32.totalorder %s768_s28, 2  ;;  %s480_s21 = scalar_lea.sflag [#allocation6], %s479_s20 }
 0x25e   : > { %p594_p1 = pnand %p994_p0, %p993_p12 }
 0x260   : > { %p595_p2 = pneg %p594_p1 }
 0x262   : > { %743 = dma.done.wait (%p595_p2), %s480_s21, 16  }
 0x263   : > { %745 = vsyncadd (%p595_p2), %s480_s21, 4294967280  ;;  %s23_s28 = sadd.s32 1, %s768_s28   ;;  %s995_s23 = smov %s752_s24 }
 0x264   : > { %p20_p3 = scmp.ge.s32.totalorder %s23_s28, 4   ;;  %s996_s24 = smov %s756_s25 }
 0x265   : > { %s997_s25 = smov %s869_s12  ;;  %s998_s26 = smov %s764_s27 }
 0x266   : > { %s999_s27 = smov %s1001_s30  ;;  %22 = sbr.rel (!%p20_p3) target bundleno = 8 (0x8), region = 100 }
 0x26b   :  { %484 = vsyncpa [#allocation5], 1 }
 0x26c   :  { %486 = vsyncpa [#allocation5 + $0x1], 1 }
 0x26d   :  { %487 = vsyncpa [#allocation6], 1 }
 0x26e   :  { %489 = vsyncpa [#allocation6 + $0x1], 1 }

</bundles_post_ra>
